<compile_context>
chip_gen: v5e
topology: v5e:2x2
jax: 0.10.0
libtpu: 0.0.40
codegen_flags: <defaults>
</compile_context>

<pallas_src>
import math
from functools import partial

import jax
import jax.numpy as jnp
from jax.experimental import pallas as pl
from jax.experimental.pallas import tpu as pltpu

EPS = 1e-5  # nn.BatchNorm2d default eps


# --------------------------------------------------------------------------- #
# Kernels
# --------------------------------------------------------------------------- #
def _stats_kernel(x_ref, w_ref, stats_ref, *, rows_total, tm, need_mask):
    """Per-tile partial per-channel sum / sum-of-squares of y = x @ W."""
    y = jnp.dot(x_ref[...], w_ref[...], preferred_element_type=jnp.float32)

    def write(yv):
        s1 = jnp.sum(yv, axis=0, keepdims=True)
        s2 = jnp.sum(yv * yv, axis=0, keepdims=True)
        stats_ref[0, :, :] = jnp.concatenate([s1, s2], axis=0)

    if not need_mask:
        write(y)
    else:
        is_last = pl.program_id(0) == pl.num_programs(0) - 1

        @pl.when(jnp.logical_not(is_last))
        def _():
            write(y)

        @pl.when(is_last)
        def _():
            # Boundary tile: zero out padded (out-of-bounds) rows before reducing.
            rem = rows_total - pl.program_id(0) * tm
            row_ids = jax.lax.broadcasted_iota(jnp.int32, y.shape, 0)
            write(jnp.where(row_ids < rem, y, 0.0))


def _fused_conv_bn_relu_kernel(x_ref, w_ref, scale_ref, shift_ref, o_ref):
    """out = relu((x @ W) * scale + shift) for one row tile (BN as epilogue).

    Correctness note for the non-divisible-TM boundary tile: each output row
    depends only on its own input row, so garbage padded input rows only touch
    output rows that Pallas discards on writeback.
    """
    acc = jnp.dot(x_ref[...], w_ref[...], preferred_element_type=jnp.float32)
    o_ref[...] = jnp.maximum(acc * scale_ref[...] + shift_ref[...], 0.0)


def _resident_kernel(x_ref, w_ref, fold_ref, spread_ref, gamma_ref, beta_ref,
                     o_ref, y_ref, *, m_true):
    """Single-call path: x resident in VMEM, one matmul, in-kernel BN + ReLU."""
    y = jnp.dot(x_ref[...], w_ref[...], preferred_element_type=jnp.float32)
    y_ref[...] = y
    s1 = jnp.sum(y, axis=0, keepdims=True)          # (1, rcout)
    s2 = jnp.sum(y * y, axis=0, keepdims=True)      # (1, rcout)
    # Fold the r replicated channel blocks down to the true C_out channels.
    s1c = jnp.dot(s1, fold_ref[...], preferred_element_type=jnp.float32)  # (1, C_out)
    s2c = jnp.dot(s2, fold_ref[...], preferred_element_type=jnp.float32)
    inv_m = 1.0 / m_true
    mean = s1c * inv_m
    # NOTE: E[y^2]-E[y]^2 in f32 can lose precision for strongly non-centered
    # activations at very large M; the clamp guards against negative round-off.
    var = jnp.maximum(s2c * inv_m - mean * mean, 0.0)
    scale_c = gamma_ref[...] * jax.lax.rsqrt(var + EPS)     # (1, C_out)
    shift_c = beta_ref[...] - mean * scale_c
    # Spread back onto the widened (r*C_out) lane layout.
    scale_w = jnp.dot(scale_c, spread_ref[...], preferred_element_type=jnp.float32)
    shift_w = jnp.dot(shift_c, spread_ref[...], preferred_element_type=jnp.float32)
    o_ref[...] = jnp.maximum(y_ref[...] * scale_w + shift_w, 0.0)


# --------------------------------------------------------------------------- #
# Tiling / budgeting helpers
# --------------------------------------------------------------------------- #
def _phys_vmem_bytes():
    """Per-core physical VMEM (generation-aware); conservative fallback."""
    try:
        phys = int(pltpu.get_tpu_info().vmem_capacity_bytes)
    except Exception:
        phys = 64 << 20  # v7x per-TensorCore VMEM (most restrictive)
    return min(max(phys, 32 << 20), 128 << 20)


def _widen_factor(c_in, c_out):
    """Smallest r making both r*C_in and r*C_out multiples of 128 (lane-dense).

    Both candidate factors are powers of two, so their max is a common
    multiple.  If the widened weight would get unreasonably large (big and/or
    badly aligned channels), degrade to widening only the output (output-store
    lane density is the dominant measured lever) and finally to r=1.
    """
    r_full = max(128 // math.gcd(c_in, 128), 128 // math.gcd(c_out, 128))
    r_out = 128 // math.gcd(c_out, 128)
    for r in (r_full, r_out, 1):
        if r * max(c_in, c_out) <= 1024:
            return r
    return 1


def _pick_row_tile(m_rows, row_bytes, tile_budget, max_tile=32768):
    """Pick the per-grid-step row tile TM.

    `tile_budget` bounds the double-buffered in+out working set of one grid
    step (2 * TM * row_bytes).  Prefers: big tiles (amortize ~0.35us/step),
    >=2 balanced steps for v7x's two TensorCores, multiples of 8, and a large
    exact divisor of m_rows when one exists (otherwise the cheap masked
    boundary tile is used -- never a tiny-tile fallback).
    """
    cap = max(8, tile_budget // (2 * row_bytes))
    cap = min(cap, max_tile)
    cap = max(8, (cap // 8) * 8)

    if m_rows <= cap:
        if m_rows >= 1024:
            # Split into two balanced steps so both v7x TensorCores get work.
            tm = (((m_rows + 1) // 2) + 7) // 8 * 8
            return min(tm, m_rows)
        return m_rows  # full extent (always legal)

    # More than one step required: balance the tiles near the cap.
    ntiles = -(-m_rows // cap)
    tm = -(-m_rows // ntiles)
    tm = ((tm + 7) // 8) * 8
    tm = min(tm, cap)

    # Prefer a *large* exact divisor of m_rows (no masked boundary); otherwise
    # keep the balanced tile and rely on masking.
    lo = max((cap // 2) // 8 * 8, 512)
    for cand in range(tm, lo - 1, -8):
        if m_rows % cand == 0:
            return cand
    return tm


# --------------------------------------------------------------------------- #
# Forward
# --------------------------------------------------------------------------- #
def conv2d_forward(x, weight, bias, gamma, beta):
    """Forward pass of conv2d_ (1x1 conv -> BatchNorm2d(train) -> ReLU).

    x:      [B, H, W, C_in]  float32
    weight: [C_out, C_in, 1, 1]  (nn.Conv2d weight)
    bias:   [C_out]   (mathematically cancelled by training-mode BN; unused)
    gamma:  [C_out]   (BatchNorm2d weight)
    beta:   [C_out]   (BatchNorm2d bias)
    returns [B, H, W, C_out]
    """
    del bias  # cancelled exactly by the batch-stat BN mean subtraction

    B, H, W, C_in = x.shape
    C_out = weight.shape[0]
    M = B * H * W

    w_mat = weight.reshape(C_out, C_in).T.astype(jnp.float32)   # [C_in, C_out]

    r = _widen_factor(C_in, C_out)
    M_pad = -(-M // r) * r
    x_flat = x.reshape(M, C_in).astype(jnp.float32)
    if M_pad != M:
        # Zero rows contribute zero to the bias-free conv output and hence zero
        # to the batch statistics; their output rows are sliced off at the end.
        # TODO(synk): this costs one XLA copy of x (and a final output slice);
        # still far cheaper than the lane-sparse r=1 fallback.
        x_flat = jnp.pad(x_flat, ((0, M_pad - M), (0, 0)))
    Mw = M_pad // r
    rcin, rcout = r * C_in, r * C_out

    x2 = x_flat.reshape(Mw, rcin)                       # free row-major reshape
    eye_r = jnp.eye(r, dtype=jnp.float32)
    w_big = jnp.kron(eye_r, w_mat)                      # block-diagonal (rcin, rcout)

    phys = _phys_vmem_bytes()
    flops = int(2 * Mw * rcin * rcout)

    # ---------------- Path A: fully VMEM-resident single call ---------------
    x2_bytes = Mw * rcin * 4
    out_bytes = Mw * rcout * 4
    w_bytes = rcin * rcout * 4
    resident_need = 2 * (x2_bytes + out_bytes) + out_bytes + 2 * w_bytes + (1 << 20)
    resident_budget = int(phys * 0.55)

    if resident_need <= resident_budget:
        fold = jnp.tile(jnp.eye(C_out, dtype=jnp.float32), (r, 1))   # (rcout, C_out)
        spread = fold.T                                              # (C_out, rcout)
        gamma2 = gamma.astype(jnp.float32).reshape(1, C_out)
        beta2 = beta.astype(jnp.float32).reshape(1, C_out)

        vmem_limit = min(phys - (8 << 20), resident_need + (16 << 20))
        out = pl.pallas_call(
            partial(_resident_kernel, m_true=float(M)),
            out_shape=jax.ShapeDtypeStruct((Mw, rcout), jnp.float32),
            grid_spec=pltpu.PrefetchScalarGridSpec(
                num_scalar_prefetch=0,
                grid=(1,),
                in_specs=[
                    pl.BlockSpec((Mw, rcin), lambda i: (0, 0)),
                    pl.BlockSpec((rcin, rcout), lambda i: (0, 0)),
                    pl.BlockSpec((rcout, C_out), lambda i: (0, 0)),
                    pl.BlockSpec((C_out, rcout), lambda i: (0, 0)),
                    pl.BlockSpec((1, C_out), lambda i: (0, 0)),
                    pl.BlockSpec((1, C_out), lambda i: (0, 0)),
                ],
                out_specs=pl.BlockSpec((Mw, rcout), lambda i: (0, 0)),
                scratch_shapes=[pltpu.VMEM((Mw, rcout), jnp.float32)],
            ),
            compiler_params=pltpu.CompilerParams(
                dimension_semantics=("arbitrary",),
                vmem_limit_bytes=int(vmem_limit),
            ),
            cost_estimate=pl.CostEstimate(
                flops=flops,
                transcendentals=C_out,
                bytes_accessed=int(x2_bytes + w_bytes + out_bytes),
            ),
        )(x2, w_big, fold, spread, gamma2, beta2)

        out = out.reshape(M_pad, C_out)
        if M_pad != M:
            out = out[:M]
        return out.reshape(B, H, W, C_out)

    # ---------------- Path B: two streaming passes over HBM -----------------
    tile_budget = (phys * 2) // 3                # double-buffered in+out per step
    vmem_limit = int(min(phys - (8 << 20), tile_budget + (24 << 20)))

    row_bytes = (rcin + rcout) * 4
    TM = _pick_row_tile(Mw, row_bytes, tile_budget)
    ntiles = pl.cdiv(Mw, TM)
    need_mask = (Mw % TM) != 0

    cparams = pltpu.CompilerParams(
        dimension_semantics=("parallel",),
        vmem_limit_bytes=vmem_limit,
    )

    # ---- Pass 1: per-tile partial batch statistics (no y materialized) -----
    stats = pl.pallas_call(
        partial(_stats_kernel, rows_total=Mw, tm=TM, need_mask=need_mask),
        out_shape=jax.ShapeDtypeStruct((ntiles, 2, rcout), jnp.float32),
        grid_spec=pltpu.PrefetchScalarGridSpec(
            num_scalar_prefetch=0,
            grid=(ntiles,),
            in_specs=[
                pl.BlockSpec((TM, rcin), lambda i: (i, 0)),
                pl.BlockSpec((rcin, rcout), lambda i: (0, 0)),
            ],
            out_specs=pl.BlockSpec((1, 2, rcout), lambda i: (i, 0, 0)),
        ),
        compiler_params=cparams,
        cost_estimate=pl.CostEstimate(
            flops=flops,
            transcendentals=0,
            bytes_accessed=int(x2_bytes + w_bytes + ntiles * 2 * rcout * 4),
        ),
    )(x2, w_big)

    # ---- Glue: fold batch stats into a per-channel affine (training-mode BN,
    # biased variance, as PyTorch BatchNorm2d does in forward()). ------------
    # NOTE: E[y^2]-E[y]^2 in f32 can lose precision for strongly non-centered
    # activations; the clamp guards against negative round-off.
    tot = stats.sum(axis=0).reshape(2, r, C_out).sum(axis=1)   # (2, C_out)
    mean = tot[0] / M                                          # true M, pad rows are zero
    var = jnp.maximum(tot[1] / M - mean * mean, 0.0)
    scale = gamma.astype(jnp.float32) * jax.lax.rsqrt(var + EPS)
    shift = beta.astype(jnp.float32) - mean * scale
    scale_w = jnp.tile(scale, r).reshape(1, rcout)
    shift_w = jnp.tile(shift, r).reshape(1, rcout)

    # ---- Pass 2: fused matmul + BN epilogue + ReLU, lane-dense output ------
    out = pl.pallas_call(
        _fused_conv_bn_relu_kernel,
        out_shape=jax.ShapeDtypeStruct((Mw, rcout), jnp.float32),
        grid_spec=pltpu.PrefetchScalarGridSpec(
            num_scalar_prefetch=0,
            grid=(ntiles,),
            in_specs=[
                pl.BlockSpec((TM, rcin), lambda i: (i, 0)),
                pl.BlockSpec((rcin, rcout), lambda i: (0, 0)),
                pl.BlockSpec((1, rcout), lambda i: (0, 0)),
                pl.BlockSpec((1, rcout), lambda i: (0, 0)),
            ],
            out_specs=pl.BlockSpec((TM, rcout), lambda i: (i, 0)),
        ),
        compiler_params=cparams,
        cost_estimate=pl.CostEstimate(
            flops=flops,
            transcendentals=0,
            bytes_accessed=int(x2_bytes + w_bytes + out_bytes),
        ),
    )(x2, w_big, scale_w, shift_w)

    out = out.reshape(M_pad, C_out)
    if M_pad != M:
        out = out[:M]
    return out.reshape(B, H, W, C_out)


if __name__ == "__main__":
    B, H, W = 2, 16, 16
    C_in, C_out = 4, 8

    key = jax.random.PRNGKey(0)
    kx, kw = jax.random.split(key)

    x = jax.random.normal(kx, (B, H, W, C_in), dtype=jnp.float32)

    # Deterministic parameter init mirroring the module's __init__:
    # xavier_uniform_ on the (C_out, C_in, 1, 1) conv weight, zero bias,
    # BatchNorm2d affine params at their defaults (gamma=1, beta=0).
    fan_in, fan_out = C_in * 1 * 1, C_out * 1 * 1
    bound = math.sqrt(6.0 / (fan_in + fan_out))
    weight = jax.random.uniform(
        kw, (C_out, C_in, 1, 1), minval=-bound, maxval=bound, dtype=jnp.float32
    )
    bias = jnp.zeros((C_out,), dtype=jnp.float32)
    gamma = jnp.ones((C_out,), dtype=jnp.float32)
    beta = jnp.zeros((C_out,), dtype=jnp.float32)

    out = jax.block_until_ready(conv2d_forward(x, weight, bias, gamma, beta))

    # Pure-JAX reference of the same forward semantics.
    ref = x.reshape(-1, C_in) @ weight.reshape(C_out, C_in).T + bias
    mu = ref.mean(axis=0)
    var = ref.var(axis=0)  # biased, training-mode BN
    ref = (ref - mu) / jnp.sqrt(var + EPS) * gamma + beta
    ref = jnp.maximum(ref, 0.0).reshape(B, H, W, C_out)

    assert out.shape == (B, H, W, C_out)
    assert jnp.allclose(out, ref, atol=1e-4, rtol=1e-4)

    print("KERNEL_OK")
</pallas_src>

<mosaic_0001>
module attributes {stable_mosaic.version = 11 : i64} {
  func.func @_resident_kernel(%arg0: i32, %arg1: memref<16x128xf32, #tpu.memory_space<vmem>>, %arg2: memref<128x256xf32, #tpu.memory_space<vmem>>, %arg3: memref<256x8xf32, #tpu.memory_space<vmem>>, %arg4: memref<8x256xf32, #tpu.memory_space<vmem>>, %arg5: memref<1x8xf32, #tpu.memory_space<vmem>>, %arg6: memref<1x8xf32, #tpu.memory_space<vmem>>, %arg7: memref<16x256xf32, #tpu.memory_space<vmem>>, %arg8: memref<16x256xf32, #tpu.memory_space<vmem>>) attributes {dimension_semantics = [#tpu.dimension_semantics<arbitrary>], iteration_bounds = array<i64: 1>, scalar_prefetch = 0 : i64, scratch_operands = 1 : i64, tpu.core_type = #tpu.core_type<tc>, window_params = [{pipeline_mode = #tpu.pipeline_mode<synchronous>, transform_indices = @transform_0, window_bounds = array<i64: 16, 128>}, {pipeline_mode = #tpu.pipeline_mode<synchronous>, transform_indices = @transform_1, window_bounds = array<i64: 128, 256>}, {pipeline_mode = #tpu.pipeline_mode<synchronous>, transform_indices = @transform_2, window_bounds = array<i64: 256, 8>}, {pipeline_mode = #tpu.pipeline_mode<synchronous>, transform_indices = @transform_3, window_bounds = array<i64: 8, 256>}, {pipeline_mode = #tpu.pipeline_mode<synchronous>, transform_indices = @transform_4, window_bounds = array<i64: 1, 8>}, {pipeline_mode = #tpu.pipeline_mode<synchronous>, transform_indices = @transform_5, window_bounds = array<i64: 1, 8>}, {pipeline_mode = #tpu.pipeline_mode<synchronous>, transform_indices = @transform_6, window_bounds = array<i64: 16, 256>}]} {
    %c0 = arith.constant 0 : index
    %c0_0 = arith.constant 0 : index
    %0 = vector.load %arg1[%c0, %c0_0] : memref<16x128xf32, #tpu.memory_space<vmem>>, vector<16x128xf32>
    %c0_1 = arith.constant 0 : index
    %c0_2 = arith.constant 0 : index
    %1 = vector.load %arg2[%c0_1, %c0_2] : memref<128x256xf32, #tpu.memory_space<vmem>>, vector<128x256xf32>
    %cst = arith.constant dense<0.000000e+00> : vector<16x256xf32>
    %2 = tpu.matmul %0, %1, %cst {dimension_numbers = #tpu.dot_dimension_numbers<[1], [0], [0], [1], [0, 0, 1, 1], [], []>} : vector<16x128xf32>, vector<128x256xf32>, vector<16x256xf32> -> vector<16x256xf32>
    %c0_3 = arith.constant 0 : index
    %c0_4 = arith.constant 0 : index
    %3 = vector.load %arg8[%c0_3, %c0_4] : memref<16x256xf32, #tpu.memory_space<vmem>>, vector<16x256xf32>
    tpu.vector_store %arg8[%c0_3, %c0_4], %2 {strides = array<i32>} : memref<16x256xf32, #tpu.memory_space<vmem>>, vector<16x256xf32>,
    %cst_5 = arith.constant dense<0.000000e+00> : vector<256xf32>
    %4 = vector.multi_reduction <add>, %2, %cst_5 [0] : vector<16x256xf32> to vector<256xf32>
    %5 = vector.shape_cast %4 : vector<256xf32> to vector<1x256xf32>
    %6 = arith.mulf %2, %2 : vector<16x256xf32>
    %cst_6 = arith.constant dense<0.000000e+00> : vector<256xf32>
    %7 = vector.multi_reduction <add>, %6, %cst_6 [0] : vector<16x256xf32> to vector<256xf32>
    %8 = vector.shape_cast %7 : vector<256xf32> to vector<1x256xf32>
    %c0_7 = arith.constant 0 : index
    %c0_8 = arith.constant 0 : index
    %9 = vector.load %arg3[%c0_7, %c0_8] : memref<256x8xf32, #tpu.memory_space<vmem>>, vector<256x8xf32>
    %cst_9 = arith.constant dense<0.000000e+00> : vector<1x8xf32>
    %10 = tpu.matmul %5, %9, %cst_9 {dimension_numbers = #tpu.dot_dimension_numbers<[1], [0], [0], [1], [0, 0, 1, 1], [], []>} : vector<1x256xf32>, vector<256x8xf32>, vector<1x8xf32> -> vector<1x8xf32>
    %c0_10 = arith.constant 0 : index
    %c0_11 = arith.constant 0 : index
    %11 = vector.load %arg3[%c0_10, %c0_11] : memref<256x8xf32, #tpu.memory_space<vmem>>, vector<256x8xf32>
    %cst_12 = arith.constant dense<0.000000e+00> : vector<1x8xf32>
    %12 = tpu.matmul %8, %11, %cst_12 {dimension_numbers = #tpu.dot_dimension_numbers<[1], [0], [0], [1], [0, 0, 1, 1], [], []>} : vector<1x256xf32>, vector<256x8xf32>, vector<1x8xf32> -> vector<1x8xf32>
    %cst_13 = arith.constant 0.001953125 : f32
    %13 = vector.broadcast %cst_13 : f32 to vector<1x8xf32>
    %14 = arith.mulf %10, %13 : vector<1x8xf32>
    %cst_14 = arith.constant 0.001953125 : f32
    %15 = vector.broadcast %cst_14 : f32 to vector<1x8xf32>
    %16 = arith.mulf %12, %15 : vector<1x8xf32>
    %17 = arith.mulf %14, %14 : vector<1x8xf32>
    %18 = arith.subf %16, %17 : vector<1x8xf32>
    %cst_15 = arith.constant 0.000000e+00 : f32
    %19 = vector.broadcast %cst_15 : f32 to vector<1x8xf32>
    %20 = arith.maximumf %18, %19 : vector<1x8xf32>
    %c0_16 = arith.constant 0 : index
    %c0_17 = arith.constant 0 : index
    %21 = vector.load %arg5[%c0_16, %c0_17] : memref<1x8xf32, #tpu.memory_space<vmem>>, vector<1x8xf32>
    %cst_18 = arith.constant 9.99999974E-6 : f32
    %22 = vector.broadcast %cst_18 : f32 to vector<1x8xf32>
    %23 = arith.addf %20, %22 : vector<1x8xf32>
    %24 = math.rsqrt %23 : vector<1x8xf32>
    %25 = arith.mulf %21, %24 : vector<1x8xf32>
    %c0_19 = arith.constant 0 : index
    %c0_20 = arith.constant 0 : index
    %26 = vector.load %arg6[%c0_19, %c0_20] : memref<1x8xf32, #tpu.memory_space<vmem>>, vector<1x8xf32>
    %27 = arith.mulf %14, %25 : vector<1x8xf32>
    %28 = arith.subf %26, %27 : vector<1x8xf32>
    %c0_21 = arith.constant 0 : index
    %c0_22 = arith.constant 0 : index
    %29 = vector.load %arg4[%c0_21, %c0_22] : memref<8x256xf32, #tpu.memory_space<vmem>>, vector<8x256xf32>
    %cst_23 = arith.constant dense<0.000000e+00> : vector<1x256xf32>
    %30 = tpu.matmul %25, %29, %cst_23 {dimension_numbers = #tpu.dot_dimension_numbers<[1], [0], [0], [1], [0, 0, 1, 1], [], []>} : vector<1x8xf32>, vector<8x256xf32>, vector<1x256xf32> -> vector<1x256xf32>
    %c0_24 = arith.constant 0 : index
    %c0_25 = arith.constant 0 : index
    %31 = vector.load %arg4[%c0_24, %c0_25] : memref<8x256xf32, #tpu.memory_space<vmem>>, vector<8x256xf32>
    %cst_26 = arith.constant dense<0.000000e+00> : vector<1x256xf32>
    %32 = tpu.matmul %28, %31, %cst_26 {dimension_numbers = #tpu.dot_dimension_numbers<[1], [0], [0], [1], [0, 0, 1, 1], [], []>} : vector<1x8xf32>, vector<8x256xf32>, vector<1x256xf32> -> vector<1x256xf32>
    %c0_27 = arith.constant 0 : index
    %c0_28 = arith.constant 0 : index
    %33 = vector.load %arg8[%c0_27, %c0_28] : memref<16x256xf32, #tpu.memory_space<vmem>>, vector<16x256xf32>
    %34 = vector.broadcast %30 : vector<1x256xf32> to vector<16x256xf32>
    %35 = arith.mulf %33, %34 : vector<16x256xf32>
    %36 = vector.broadcast %32 : vector<1x256xf32> to vector<16x256xf32>
    %37 = arith.addf %35, %36 : vector<16x256xf32>
    %cst_29 = arith.constant 0.000000e+00 : f32
    %38 = vector.broadcast %cst_29 : f32 to vector<16x256xf32>
    %39 = arith.maximumf %37, %38 : vector<16x256xf32>
    %c0_30 = arith.constant 0 : index
    %c0_31 = arith.constant 0 : index
    %40 = vector.load %arg7[%c0_30, %c0_31] : memref<16x256xf32, #tpu.memory_space<vmem>>, vector<16x256xf32>
    tpu.vector_store %arg7[%c0_30, %c0_31], %39 {strides = array<i32>} : memref<16x256xf32, #tpu.memory_space<vmem>>, vector<16x256xf32>,
    return
  }
  func.func @transform_0(%arg0: i32) -> (i32, i32) {
    %c0_i32 = arith.constant 0 : i32
    %c0_i32_0 = arith.constant 0 : i32
    %c0_i32_1 = arith.constant 0 : i32
    return %c0_i32, %c0_i32_0 : i32, i32
  }
  func.func @transform_1(%arg0: i32) -> (i32, i32) {
    %c0_i32 = arith.constant 0 : i32
    %c0_i32_0 = arith.constant 0 : i32
    %c0_i32_1 = arith.constant 0 : i32
    return %c0_i32, %c0_i32_0 : i32, i32
  }
  func.func @transform_2(%arg0: i32) -> (i32, i32) {
    %c0_i32 = arith.constant 0 : i32
    %c0_i32_0 = arith.constant 0 : i32
    %c0_i32_1 = arith.constant 0 : i32
    return %c0_i32, %c0_i32_0 : i32, i32
  }
  func.func @transform_3(%arg0: i32) -> (i32, i32) {
    %c0_i32 = arith.constant 0 : i32
    %c0_i32_0 = arith.constant 0 : i32
    %c0_i32_1 = arith.constant 0 : i32
    return %c0_i32, %c0_i32_0 : i32, i32
  }
  func.func @transform_4(%arg0: i32) -> (i32, i32) {
    %c0_i32 = arith.constant 0 : i32
    %c0_i32_0 = arith.constant 0 : i32
    %c0_i32_1 = arith.constant 0 : i32
    return %c0_i32, %c0_i32_0 : i32, i32
  }
  func.func @transform_5(%arg0: i32) -> (i32, i32) {
    %c0_i32 = arith.constant 0 : i32
    %c0_i32_0 = arith.constant 0 : i32
    %c0_i32_1 = arith.constant 0 : i32
    return %c0_i32, %c0_i32_0 : i32, i32
  }
  func.func @transform_6(%arg0: i32) -> (i32, i32) {
    %c0_i32 = arith.constant 0 : i32
    %c0_i32_0 = arith.constant 0 : i32
    %c0_i32_1 = arith.constant 0 : i32
    return %c0_i32, %c0_i32_0 : i32, i32
  }
}

</mosaic_0001>

<bundles_post_ra>
// kernel: tpu_custom_call.1
= control target key start
LH: loop header
LB: loop body
LE: loop exit
PB: predicated region body
PF: predicated region fallthrough
CT: control target
= control target key end

     0   :  { %11 = vsyncpa [#allocation4], 0  ;;  %s754_s0 = inlined_call_operand.vmem [shape: f32[16,128], index: 0, kind: input, shape index: {}]   ;;  %s755_s1 = inlined_call_operand.vmem [shape: f32[128,256], index: 1, kind: input, shape index: {}]   ;;  %s756_s2 = inlined_call_operand.vmem [shape: f32[256,8], index: 2, kind: input, shape index: {}]   ;;  %s757_s3 = inlined_call_operand.hbm [shape: f32[8,256], index: 3, kind: input, shape index: {}]   ;;  %s758_s4 = inlined_call_operand.vmem [shape: f32[1,8], index: 4, kind: input, shape index: {}]   ;;  %s759_s5 = inlined_call_operand.vmem [shape: f32[1,8], index: 5, kind: input, shape index: {}]   ;;  %s760_s6 = inlined_call_operand.hbm [shape: f32[16,256], index: 6, kind: output, shape index: {}]  }
   0x1   :  { %12 = vsyncpa [#allocation5], 0  ;;  %s24_s23 = sshll.u32 %s757_s3, 4  ;;  %s481_s24 = smov [#allocation3]   ;;  %s25_s23 = int_to_ptr.hbm [resolvable:$true] %s24_s23 }
   0x2   :  { %s26_s25 = sshll.u32 %s481_s24, 4  ;;  %s27_s25 = int_to_ptr.vmem [resolvable:$true] %s26_s25 }
   0x3   :  { %29 = dma.hbm_to_vmem [thread:$0]  %s25_s23, 256, %s27_s25, [#allocation4]  }
   0x4   :  { %477 = dma.done.wait [#allocation4], 256  }
   0x5   :  { %478 = vsyncadd [#allocation4], 4294967040  ;;  %v70_v0 = vld [vmem:[%s755_s1 + $0xf0] sm:$0xff]  ;;  %v71_v1 = vld [vmem:[%s755_s1 + $0xf8] sm:$0xff]  ;;  %vm289_vm3 = vcmask 64512   ;;  %s406_s9 = sshll.u32 %s760_s6, 4  ;;  %s407_s9 = int_to_ptr.hbm [resolvable:$true] %s406_s9 }
   0x6   :  { %v68_v2 = vld [vmem:[%s755_s1 + $0xe0] sm:$0xff]  ;;  %72 = vmatpush.msra.mxu0 %v70_v0  ;;  %95 = vmatpush.msra.mxu1 %v71_v1  ;;  %v69_v3 = vld [vmem:[%s755_s1 + $0xe8] sm:$0xff]  ;;  %v66_v4 = vld [vmem:[%s755_s1 + $0xd0] sm:$0xff]  ;;  %s484_s10 = smov 16  }
   0x7   :  { %v67_v5 = vld [vmem:[%s755_s1 + $0xd8] sm:$0xff]  ;;  %v64_v6 = vld [vmem:[%s755_s1 + $0xc0] sm:$0xff]  ;;  %v65_v7 = vld [vmem:[%s755_s1 + $0xc8] sm:$0xff] }
   0x8   :  { %73 = vmatpush.msra.mxu0 %v68_v2  ;;  %96 = vmatpush.msra.mxu1 %v69_v3  ;;  %v62_v8 = vld [vmem:[%s755_s1 + $0xb0] sm:$0xff]  ;;  %v63_v9 = vld [vmem:[%s755_s1 + $0xb8] sm:$0xff]  ;;  %v60_v10 = vld [vmem:[%s755_s1 + $0xa0] sm:$0xff] }
   0x9   :  { %v61_v11 = vld [vmem:[%s755_s1 + $0xa8] sm:$0xff]  ;;  %v58_v12 = vld [vmem:[%s755_s1 + $0x90] sm:$0xff]  ;;  %v59_v13 = vld [vmem:[%s755_s1 + $0x98] sm:$0xff] }
   0xa   :  { %74 = vmatpush.msra.mxu0 %v66_v4  ;;  %97 = vmatpush.msra.mxu1 %v67_v5  ;;  %v56_v14 = vld [vmem:[%s755_s1 + $0x80] sm:$0xff]  ;;  %v169_v15 = vld [vmem:[%s756_s2 + $0x78] sm:$0xff]  ;;  %v57_v17 = vld [vmem:[%s755_s1 + $0x88] sm:$0xff] }
   0xb   :  { %v185_v16 = vld [vmem:[%s756_s2 + $0xf8] sm:$0xff]  ;;  %186 = vmatpush.msra.mxu2 %v169_v15  ;;  %v168_v18 = vld [vmem:[%s756_s2 + $0x70] sm:$0xff]  ;;  %v167_v20 = vld [vmem:[%s756_s2 + $0x68] sm:$0xff] }
   0xc   :  { %75 = vmatpush.msra.mxu0 %v64_v6  ;;  %98 = vmatpush.msra.mxu1 %v65_v7  ;;  %v184_v19 = vld [vmem:[%s756_s2 + $0xf0] sm:$0xff]  ;;  %v183_v21 = vld [vmem:[%s756_s2 + $0xe8] sm:$0xff]  ;;  %v55_v23 = vld [vmem:[%s755_s1 + $0x78] sm:$0xff] }
   0xd   :  { %206 = vmatpush.msra.mxu3 %v185_v16  ;;  %v54_v22 = vld [vmem:[%s755_s1 + $0x70] sm:$0xff]  ;;  %187 = vmatpush.msra.mxu2 %v168_v18  ;;  %v166_v24 = vld [vmem:[%s756_s2 + $0x60] sm:$0xff]  ;;  %v53_v27 = vld [vmem:[%s755_s1 + $0x68] sm:$0xff] }
   0xe   :  { %76 = vmatpush.msra.mxu0 %v62_v8  ;;  %99 = vmatpush.msra.mxu1 %v63_v9  ;;  %v182_v25 = vld [vmem:[%s756_s2 + $0xe0] sm:$0xff]  ;;  %v50_v28 = vld [vmem:[%s755_s1 + $0x50] sm:$0xff]  ;;  %v51_v29 = vld [vmem:[%s755_s1 + $0x58] sm:$0xff] }
   0xf   :  { %207 = vmatpush.msra.mxu3 %v184_v19  ;;  %v52_v26 = vld [vmem:[%s755_s1 + $0x60] sm:$0xff]  ;;  %188 = vmatpush.msra.mxu2 %v167_v20  ;;  %v49_v31 = vld [vmem:[%s755_s1 + $0x48] sm:$0xff]  ;;  %v46_v32 = vld [vmem:[%s755_s1 + $0x30] sm:$0xff] }
  0x10   :  { %77 = vmatpush.msra.mxu0 %v60_v10  ;;  %100 = vmatpush.msra.mxu1 %v61_v11  ;;  %v48_v30 = vld [vmem:[%s755_s1 + $0x40] sm:$0xff]  ;;  %v47_v33 = vld [vmem:[%s755_s1 + $0x38] sm:$0xff]  ;;  %v45_v35 = vld [vmem:[%s755_s1 + $0x28] sm:$0xff] }
  0x11   :  { %208 = vmatpush.msra.mxu3 %v183_v21  ;;  %189 = vmatpush.msra.mxu2 %v166_v24  ;;  %v44_v34 = vld [vmem:[%s755_s1 + $0x20] sm:$0xff]  ;;  %v42_v36 = vld [vmem:[%s755_s1 + $0x10] sm:$0xff]  ;;  %v43_v37 = vld [vmem:[%s755_s1 + $0x18] sm:$0xff] }
  0x12   :  { %78 = vmatpush.msra.mxu0 %v58_v12  ;;  %101 = vmatpush.msra.mxu1 %v59_v13  ;;  %v40_v38 = vld [vmem:[%s755_s1] sm:$0xff]  ;;  %v41_v39 = vld [vmem:[%s755_s1 + $0x8] sm:$0xff]  ;;  %v165_v42 = vld [vmem:[%s756_s2 + $0x58] sm:$0xff]  ;;  %s483_s1 = smov 256  }
  0x13   :  { %209 = vmatpush.msra.mxu3 %v182_v25  ;;  %v38_v40 = vld [vmem:[%s754_s0] sm:$0xff]  ;;  %v39_v41 = vld [vmem:[%s754_s0 + $0x8] sm:$0xff]  ;;  %v181_v43 = vld [vmem:[%s756_s2 + $0xd8] sm:$0xff]  ;;  %190 = vmatpush.msra.mxu2 %v165_v42 }
  0x14   :  { %79 = vmatpush.msra.mxu0 %v56_v14  ;;  %102 = vmatpush.msra.mxu1 %v57_v17  ;;  %v164_v44 = vld [vmem:[%s756_s2 + $0x50] sm:$0xff]  ;;  %v163_v46 = vld [vmem:[%s756_s2 + $0x48] sm:$0xff]  ;;  %v162_v48 = vld [vmem:[%s756_s2 + $0x40] sm:$0xff] }
  0x15   :  { %210 = vmatpush.msra.mxu3 %v181_v43  ;;  %v180_v45 = vld [vmem:[%s756_s2 + $0xd0] sm:$0xff]  ;;  %191 = vmatpush.msra.mxu2 %v164_v44  ;;  %v179_v47 = vld [vmem:[%s756_s2 + $0xc8] sm:$0xff]  ;;  %v178_v49 = vld [vmem:[%s756_s2 + $0xc0] sm:$0xff] }
  0x16   :  { %80 = vmatpush.msra.mxu0 %v54_v22  ;;  %103 = vmatpush.msra.mxu1 %v55_v23  ;;  %v161_v50 = vld [vmem:[%s756_s2 + $0x38] sm:$0xff]  ;;  %v160_v52 = vld [vmem:[%s756_s2 + $0x30] sm:$0xff]  ;;  %v159_v54 = vld [vmem:[%s756_s2 + $0x28] sm:$0xff] }
  0x17   :  { %211 = vmatpush.msra.mxu3 %v180_v45  ;;  %192 = vmatpush.msra.mxu2 %v163_v46  ;;  %v177_v51 = vld [vmem:[%s756_s2 + $0xb8] sm:$0xff]  ;;  %v176_v53 = vld [vmem:[%s756_s2 + $0xb0] sm:$0xff]  ;;  %v175_v55 = vld [vmem:[%s756_s2 + $0xa8] sm:$0xff] }
  0x18   :  { %81 = vmatpush.msra.mxu0 %v52_v26  ;;  %104 = vmatpush.msra.mxu1 %v53_v27  ;;  %v158_v56 = vld [vmem:[%s756_s2 + $0x20] sm:$0xff]  ;;  %v157_v58 = vld [vmem:[%s756_s2 + $0x18] sm:$0xff]  ;;  %v156_v60 = vld [vmem:[%s756_s2 + $0x10] sm:$0xff] }
  0x19   :  { %212 = vmatpush.msra.mxu3 %v179_v47  ;;  %193 = vmatpush.msra.mxu2 %v162_v48  ;;  %v174_v57 = vld [vmem:[%s756_s2 + $0xa0] sm:$0xff]  ;;  %v173_v59 = vld [vmem:[%s756_s2 + $0x98] sm:$0xff]  ;;  %v172_v61 = vld [vmem:[%s756_s2 + $0x90] sm:$0xff] }
  0x1a   :  { %82 = vmatpush.msra.mxu0 %v50_v28  ;;  %105 = vmatpush.msra.mxu1 %v51_v29  ;;  %v155_v62 = vld [vmem:[%s756_s2 + $0x8] sm:$0xff]  ;;  %v154_v0 = vld [vmem:[%s756_s2] sm:$0xff] }
  0x1b   :  { %213 = vmatpush.msra.mxu3 %v178_v49  ;;  %194 = vmatpush.msra.mxu2 %v161_v50  ;;  %v171_v63 = vld [vmem:[%s756_s2 + $0x88] sm:$0xff]  ;;  %v170_v1 = vld [vmem:[%s756_s2 + $0x80] sm:$0xff] }
  0x1c   :  { %83 = vmatpush.msra.mxu0 %v48_v30  ;;  %106 = vmatpush.msra.mxu1 %v49_v31 }
  0x1d   :  { %214 = vmatpush.msra.mxu3 %v177_v51  ;;  %195 = vmatpush.msra.mxu2 %v160_v52 }
  0x1e   :  { %84 = vmatpush.msra.mxu0 %v46_v32  ;;  %107 = vmatpush.msra.mxu1 %v47_v33 }
  0x1f   :  { %215 = vmatpush.msra.mxu3 %v176_v53  ;;  %196 = vmatpush.msra.mxu2 %v159_v54 }
  0x20   :  { %85 = vmatpush.msra.mxu0 %v44_v34  ;;  %108 = vmatpush.msra.mxu1 %v45_v35 }
  0x21   :  { %216 = vmatpush.msra.mxu3 %v175_v55  ;;  %197 = vmatpush.msra.mxu2 %v158_v56 }
  0x22   :  { %86 = vmatpush.msra.mxu0 %v42_v36  ;;  %109 = vmatpush.msra.mxu1 %v43_v37 }
  0x23   :  { %217 = vmatpush.msra.mxu3 %v174_v57  ;;  %198 = vmatpush.msra.mxu2 %v157_v58 }
  0x24   :  { %87 = vmatpush.msra.mxu0 %v40_v38  ;;  %110 = vmatpush.msra.mxu1 %v41_v39 }
  0x25   :  { %88 = vmatmul.f32.vlgmr.msra.gmra.mxu0 %v38_v40  ;;  %111 = vmatmul.f32.vlgmr.msra.gmra.mxu1 %v38_v40  ;;  %v287_v40 = vld [vmem:[#allocation3] sm:$0xff] }
  0x26   :  { %226 = vmatpush.msrb.mxu0 %v169_v15  ;;  %246 = vmatpush.msrb.mxu1 %v185_v16 }
  0x27   :  { %218 = vmatpush.msra.mxu3 %v173_v59  ;;  %199 = vmatpush.msra.mxu2 %v156_v60 }
  0x28   :  { %227 = vmatpush.msrb.mxu0 %v168_v18  ;;  %247 = vmatpush.msrb.mxu1 %v184_v19 }
  0x29   :  { %219 = vmatpush.msra.mxu3 %v172_v61  ;;  %200 = vmatpush.msra.mxu2 %v155_v62 }
  0x2a   :  { %228 = vmatpush.msrb.mxu0 %v167_v20  ;;  %248 = vmatpush.msrb.mxu1 %v183_v21 }
  0x2b   :  { %220 = vmatpush.msra.mxu3 %v171_v63  ;;  %201 = vmatpush.msra.mxu2 %v154_v0 }
  0x2c   :  { %229 = vmatpush.msrb.mxu0 %v166_v24  ;;  %249 = vmatpush.msrb.mxu1 %v182_v25 }
  0x2d   :  { %91 = vmatmul.f32.gmra.mxu0 %v39_v41  ;;  %114 = vmatmul.f32.gmra.mxu1 %v39_v41  ;;  %v288_v41 = vld [vmem:[#allocation3 + $0x8] sm:$0xff] }
  0x2e   :  { %230 = vmatpush.msrb.mxu0 %v165_v42  ;;  %250 = vmatpush.msrb.mxu1 %v181_v43 }
  0x2f   :  { %221 = vmatpush.msra.mxu3 %v170_v1  ;;  %308 = vmatpush.msrb.mxu2 %v287_v40 }
  0x30   :  { %231 = vmatpush.msrb.mxu0 %v164_v44  ;;  %251 = vmatpush.msrb.mxu1 %v180_v45 }
  0x31   :  { %328 = vmatpush.msrb.mxu3 %v288_v41 }
  0x32   :  { %232 = vmatpush.msrb.mxu0 %v163_v46  ;;  %252 = vmatpush.msrb.mxu1 %v179_v47 }
  0x34   :  { %233 = vmatpush.msrb.mxu0 %v162_v48  ;;  %253 = vmatpush.msrb.mxu1 %v178_v49 }
  0x36   :  { %234 = vmatpush.msrb.mxu0 %v161_v50  ;;  %254 = vmatpush.msrb.mxu1 %v177_v51 }
  0x38   :  { %235 = vmatpush.msrb.mxu0 %v160_v52  ;;  %255 = vmatpush.msrb.mxu1 %v176_v53 }
  0x3a   :  { %236 = vmatpush.msrb.mxu0 %v159_v54  ;;  %256 = vmatpush.msrb.mxu1 %v175_v55 }
  0x3c   :  { %237 = vmatpush.msrb.mxu0 %v158_v56  ;;  %257 = vmatpush.msrb.mxu1 %v174_v57  ;;  %v271_v57 = vld [vmem:[%s758_s4] sm:$0x1]  ;;  %s482_s4 = smov [#allocation6]  }
  0x3e   :  { %238 = vmatpush.msrb.mxu0 %v157_v58  ;;  %258 = vmatpush.msrb.mxu1 %v173_v59 }
  0x40   :  { %239 = vmatpush.msrb.mxu0 %v156_v60  ;;  %259 = vmatpush.msrb.mxu1 %v172_v61 }
  0x42   :  { %240 = vmatpush.msrb.mxu0 %v155_v62  ;;  %260 = vmatpush.msrb.mxu1 %v171_v63  ;;  %v284_v62 = vld [vmem:[%s759_s5] sm:$0x1]  ;;  %s404_s5 = sshll.u32 %s482_s4, 4  ;;  %s405_s5 = int_to_ptr.vmem [resolvable:$true] %s404_s5 }
  0x44   :  { %241 = vmatpush.msrb.mxu0 %v154_v0  ;;  %261 = vmatpush.msrb.mxu1 %v170_v1 }
  0xa2   :  { %v721_v2 = vpop.f32.mrf.mxu0  ;;  %v723_v3 = vpop.f32.mrf.mxu1 }
  0xa3   :  { %v136_v4 = vmul.f32 %v721_v2, %v721_v2  ;;  %v137_v5 = vmul.f32 %v723_v3, %v723_v3 }
  0xaa   :  { %v729_v6 = vpop.f32.mrf.mxu0  ;;  %v731_v7 = vpop.f32.mrf.mxu1 }
  0xab   :  { %v122_v8 = vadd.f32 %v729_v6, %v721_v2  ;;  %v138_v9 = vmul.f32 %v729_v6, %v729_v6  ;;  %v129_v10 = vadd.f32 %v731_v7, %v723_v3  ;;  %v139_v11 = vmul.f32 %v731_v7, %v731_v7 }
  0xad   :  { %v123_v12 = vrot.slane %v122_v8, 4  ;;  %v140_v13 = vadd.f32 %v138_v9, %v136_v4  ;;  %v130_v14 = vrot.slane %v129_v10, 4  ;;  %v147_v15 = vadd.f32 %v139_v11, %v137_v5 }
  0xaf   :  { %v141_v16 = vrot.slane %v140_v13, 4  ;;  %v148_v17 = vrot.slane %v147_v15, 4  ;;  %v124_v18 = vadd.f32 %v123_v12, %v122_v8  ;;  %v131_v19 = vadd.f32 %v130_v14, %v129_v10 }
  0xb1   :  { %v142_v20 = vadd.f32 %v141_v16, %v140_v13  ;;  %v149_v21 = vadd.f32 %v148_v17, %v147_v15  ;;  %v125_v22 = vrot.slane %v124_v18, 2  ;;  %v132_v23 = vrot.slane %v131_v19, 2 }
  0xb3   :  { %v126_v24 = vadd.f32 %v125_v22, %v124_v18  ;;  %v133_v25 = vadd.f32 %v132_v23, %v131_v19  ;;  %v143_v26 = vrot.slane %v142_v20, 2  ;;  %v150_v27 = vrot.slane %v149_v21, 2 }
  0xb5   :  { %v127_v28 = vrot.slane %v126_v24, 1  ;;  %v134_v29 = vrot.slane %v133_v25, 1  ;;  %v144_v30 = vadd.f32 %v143_v26, %v142_v20  ;;  %v151_v31 = vadd.f32 %v150_v27, %v149_v21 }
  0xb7   :  { %v128_v32 = vadd.f32 %v127_v28, %v126_v24  ;;  %v135_v33 = vadd.f32 %v134_v29, %v133_v25  ;;  %v145_v34 = vrot.slane %v144_v30, 1  ;;  %v152_v35 = vrot.slane %v151_v31, 1 }
  0xb9   :  { %202 = vmatmul.f32.vlgmr.msra.gmra.mxu2 %v128_v32  ;;  %222 = vmatmul.f32.vlgmr.msra.gmra.mxu3 %v135_v33  ;;  %v146_v36 = vadd.f32 %v145_v34, %v144_v30  ;;  %v153_v37 = vadd.f32 %v152_v35, %v151_v31 }
  0xba   :  { %351 = vmatpush.msra.mxu2 %v287_v40  ;;  %371 = vmatpush.msra.mxu3 %v288_v41 }
  0xbb   :  { %242 = vmatmul.f32.vlgmr.msrb.gmra.mxu0 %v146_v36  ;;  %262 = vmatmul.f32.vlgmr.msrb.gmra.mxu1 %v153_v37 }
 0x138   :  { %v243_v38 = vpop.f32.mrf.mxu0  ;;  %v263_v39 = vpop.f32.mrf.mxu1 }
 0x139   :  { %v264_v44 = vadd.f32 %v263_v39, %v243_v38 }
 0x13b   :  { %v267_v47 = vmul.f32 0.001953125, %v264_v44 }
 0x13c   :  { %v203_v42 = vpop.f32.mrf.mxu2  ;;  %v223_v43 = vpop.f32.mrf.mxu3 }
 0x13d   :  { %v224_v45 = vadd.f32 %v223_v43, %v203_v42 }
 0x13f   :  { %v266_v46 = vmul.f32 0.001953125, %v224_v45 }
 0x141   :  { %v268_v48 = vmul.f32 %v266_v46, %v266_v46 }
 0x143   :  { %v269_v49 = vsub.f32 %v267_v47, %v268_v48 }
 0x145   :  { %v270_v50 = vmax.f32 %v269_v49, 0.0 }
 0x147   :  { %v272_v51 = vadd.f32 1e-05, %v270_v50 }
 0x149   :  { %427 = vrsqrt.f32 %v272_v51  ;;  %vm279_vm1 = vweird.f32 %v272_v51 }
 0x14f   :  { %v428_v52 = vpop.eup %427 }
 0x150   :  { %v274_v53 = vmul.f32 %v428_v52, %v272_v51  ;;  %vm280_vm0 = vweird.f32 %v428_v52 }
 0x151   :  { %vm281_vm2 = vmor %vm279_vm1, %vm280_vm0 }
 0x152   :  { %v275_v54 = vmul.f32 %v428_v52, %v274_v53 }
 0x154   :  { %v276_v55 = vmul.f32 0.5, %v275_v54 }
 0x156   :  { %v277_v56 = vsub.f32 1.5, %v276_v55 }
 0x158   :  { %v278_v58 = vmul.f32 %v428_v52, %v277_v56 }
 0x15a   :  { %v282_v59 = vsel %vm281_vm2, %v428_v52, %v278_v58 }
 0x15b   :  { %v283_v60 = vmul.f32 %v282_v59, %v271_v57 }
 0x15d   :  { %419 = vmatmul.msk.f32.vlgmr.msrb.gmra.mxu2 %vm289_vm3, %v283_v60  ;;  %420 = vmatmul.msk.f32.vlgmr.msrb.gmra.mxu3 %vm289_vm3, %v283_v60  ;;  %v285_v61 = vmul.f32 %v283_v60, %v266_v46 }
 0x15f   :  { %v286_v63 = vsub.f32 %v284_v62, %v285_v61 }
 0x165   :  { %421 = vmatmul.msk.f32.vlgmr.msra.gmra.mxu2 %vm289_vm3, %v286_v63  ;;  %422 = vmatmul.msk.f32.vlgmr.msra.gmra.mxu3 %vm289_vm3, %v286_v63 }
 0x1e0   :  { %v310_v0 = vpop.f32.mrf.mxu2  ;;  %v330_v1 = vpop.f32.mrf.mxu3 }
 0x1e1   :  { %v380_v4 = vperm.slane %v310_v0, 0  ;;  %v381_v5 = vperm.slane %v330_v1, 0 }
 0x1e3   :  { %v382_v8 = vmul.f32 %v380_v4, %v721_v2  ;;  %v384_v9 = vmul.f32 %v380_v4, %v729_v6  ;;  %v383_v12 = vmul.f32 %v381_v5, %v723_v3  ;;  %v385_v13 = vmul.f32 %v381_v5, %v731_v7 }
 0x1e8   :  { %v353_v10 = vpop.f32.mrf.mxu2  ;;  %v373_v11 = vpop.f32.mrf.mxu3 }
 0x1e9   :  { %v386_v14 = vperm.slane %v353_v10, 0  ;;  %v387_v15 = vperm.slane %v373_v11, 0 }
 0x1eb   :  { %v388_v16 = vadd.f32 %v386_v14, %v382_v8  ;;  %v390_v17 = vadd.f32 %v386_v14, %v384_v9  ;;  %v389_v18 = vadd.f32 %v387_v15, %v383_v12  ;;  %v391_v19 = vadd.f32 %v387_v15, %v385_v13 }
 0x1ed   :  { %v392_v2 = vmax.f32 %v388_v16, 0.0  ;;  %v394_v6 = vmax.f32 %v390_v17, 0.0  ;;  %v393_v20 = vmax.f32 %v389_v18, 0.0  ;;  %v395_v21 = vmax.f32 %v391_v19, 0.0 }
 0x1ef   :  { %396 = vst [vmem:[#allocation6] sm:$0xff] %v392_v2 }
 0x1f0   :  { %398 = vst [vmem:[#allocation6 + $0x10] sm:$0xff] %v394_v6 }
 0x1f1   :  { %397 = vst [vmem:[#allocation6 + $0x8] sm:$0xff] %v393_v20 }
 0x1f2   :  { %399 = vst [vmem:[#allocation6 + $0x18] sm:$0xff] %v395_v21 }
 0x1f3   :  { %412 = dma.vmem_to_hbm [thread:$0]  %s405_s5, 512, %s407_s9, [#allocation5], %s483_s1, %s483_s1, %s484_s10  }
 0x1f4   :  { %479 = dma.done.wait [#allocation5], 512  }
 0x1f5   :  { %480 = vsyncadd [#allocation5], 4294966784 }
 0x1f6   :  { %417 = vsyncpa [#allocation4], 1 }
 0x1f7   :  { %418 = vsyncpa [#allocation5], 1 }

</bundles_post_ra>
